<compile_context>
chip_gen: v7x
topology: tpu7x:2x2x1
jax: 0.10.0
libtpu: 0.0.40
codegen_flags: <defaults>
</compile_context>

<pallas_src>
import functools

import jax
import jax.numpy as jnp
from jax.experimental import pallas as pl
from jax.experimental.pallas import tpu as pltpu


# Conservative row alignment for chunk starts: covers lane tiling (128) for
# 1-D arrays and sublane packing (8 / 16 / 32 for 4B / 2B / 1B dtypes) for 2-D
# arrays.  Leading axes of >=3-D arrays are not part of the minor tile, so
# this is more than enough there too.
_ROW_ALIGN = 256


def _chunk_plan(shape, dtype, max_chunks, min_bytes_per_chunk):
    """Static per-shape plan: None => one whole-ref DMA, else ((start, rows), ...)."""
    if len(shape) == 0:
        return None
    rows = int(shape[0])
    itemsize = jnp.dtype(dtype).itemsize
    row_bytes = itemsize
    for d in shape[1:]:
        row_bytes *= int(d)
    total_bytes = rows * row_bytes
    if total_bytes < 2 * min_bytes_per_chunk or rows < 2 * _ROW_ALIGN:
        return None
    n = int(min(max_chunks, total_bytes // min_bytes_per_chunk, rows // _ROW_ALIGN))
    if n <= 1:
        return None
    base = rows // n
    base = max(_ROW_ALIGN, (base // _ROW_ALIGN) * _ROW_ALIGN)
    plan = []
    start = 0
    for _ in range(n - 1):
        size = min(base, rows - start)
        if size <= 0:
            break
        plan.append((start, size))
        start += size
    if rows - start > 0:
        plan.append((start, rows - start))
    if len(plan) <= 1:
        return None
    return tuple(plan)


@functools.lru_cache(maxsize=None)
def _build_copy_fn(shape, dtype_name, plan):
    """Builds (and caches) the compiled HBM->HBM identity copy for one config."""
    dtype = jnp.dtype(dtype_name)
    n_sems = 1 if plan is None else len(plan)

    def kernel(x_hbm, o_hbm, sems):
        if plan is None:
            # Single whole-ref DMA: HBM -> HBM, no VMEM staging, no vreg traffic.
            cp = pltpu.make_async_copy(x_hbm, o_hbm, sems.at[0])
            cp.start()
            cp.wait()
        else:
            # A few row-aligned chunks: start all DMAs, then wait all, so the
            # copies overlap across DMA queues.
            copies = []
            for i, (start, size) in enumerate(plan):
                cp = pltpu.make_async_copy(
                    x_hbm.at[pl.ds(start, size)],
                    o_hbm.at[pl.ds(start, size)],
                    sems.at[i],
                )
                cp.start()
                copies.append(cp)
            for cp in copies:
                cp.wait()

    copy = pl.pallas_call(
        kernel,
        out_shape=jax.ShapeDtypeStruct(shape, dtype),
        in_specs=[pl.BlockSpec(memory_space=pl.ANY)],   # leave input in HBM
        out_specs=pl.BlockSpec(memory_space=pl.ANY),    # write output directly in HBM
        scratch_shapes=[pltpu.SemaphoreType.DMA((n_sems,))],
    )
    return jax.jit(copy)


def datamanager_forward(
    x: jax.Array,
    *,
    max_chunks: int = 4,
    min_bytes_per_chunk: int = 4 * 1024 * 1024,
    bypass_below_bytes: int = 0,
) -> jax.Array:
    """Identity 'forward' for the DataManager (its forward() is a no-op).

    Since the reference forward() has no compute, tiny batches can legally be
    returned unchanged (set bypass_below_bytes > 0 in production); larger
    batches go through a single HBM->HBM DMA copy kernel.
    """
    total_bytes = int(x.size) * jnp.dtype(x.dtype).itemsize
    if x.size == 0 or total_bytes < bypass_below_bytes:
        return x
    plan = _chunk_plan(x.shape, x.dtype, max_chunks, min_bytes_per_chunk)
    fn = _build_copy_fn(tuple(int(d) for d in x.shape), jnp.dtype(x.dtype).name, plan)
    return fn(x)


if __name__ == "__main__":
    key = jax.random.PRNGKey(0)
    k0, k1, k2 = jax.random.split(key, 3)

    # Small synthetic "ray batch": 64 rays x 10 channels (origins, dirs, extras).
    # Not lane-aligned; copied at native shape via one whole-ref DMA.
    x = jax.random.normal(k0, (64, 10), dtype=jnp.float32)
    out = jax.block_until_ready(datamanager_forward(x))
    assert out.shape == x.shape and out.dtype == x.dtype
    assert bool(jnp.array_equal(out, x))  # data has no NaNs (random normal)

    # Ragged bf16 batch: odd row count, narrow dtype, still a single DMA.
    x2 = jax.random.normal(k1, (257, 48), dtype=jnp.bfloat16)
    out2 = jax.block_until_ready(datamanager_forward(x2))
    assert out2.shape == x2.shape and out2.dtype == x2.dtype
    assert bool(jnp.array_equal(out2, x2))

    # Modest batch with chunk thresholds lowered to exercise the multi-DMA
    # (overlapped chunks) path: 1024 rays x 128 channels f32 (~512 KiB).
    x3 = jax.random.normal(k2, (1024, 128), dtype=jnp.float32)
    out3 = jax.block_until_ready(
        datamanager_forward(x3, max_chunks=2, min_bytes_per_chunk=128 * 1024)
    )
    assert out3.shape == x3.shape and out3.dtype == x3.dtype
    assert bool(jnp.array_equal(out3, x3))

    print("KERNEL_OK")
</pallas_src>

<mosaic_0001>
module attributes {stable_mosaic.version = 11 : i64} {
  func.func @kernel(%arg0: memref<64x10xf32, #tpu.memory_space<any>>, %arg1: memref<64x10xf32, #tpu.memory_space<any>>, %arg2: memref<1x!tpu.dma_semaphore, #tpu.memory_space<semaphore_mem>>) attributes {dimension_semantics = [], scalar_prefetch = 0 : i64, scratch_operands = 1 : i64, tpu.core_type = #tpu.core_type<tc>} {
    %c0_i32 = arith.constant 0 : i32
    %0 = tpu.memref_slice %arg2[%c0_i32] : memref<1x!tpu.dma_semaphore, #tpu.memory_space<semaphore_mem>> -> memref<1x!tpu.dma_semaphore, #tpu.memory_space<semaphore_mem>>
    %1 = tpu.memref_squeeze %0 : memref<1x!tpu.dma_semaphore, #tpu.memory_space<semaphore_mem>> -> memref<!tpu.dma_semaphore, #tpu.memory_space<semaphore_mem>>
    tpu.enqueue_dma source(%arg0 : memref<64x10xf32, #tpu.memory_space<any>>) target(%arg1 : memref<64x10xf32, #tpu.memory_space<any>>) target_semaphore(%1 : memref<!tpu.dma_semaphore, #tpu.memory_space<semaphore_mem>>)
    %c0_i32_0 = arith.constant 0 : i32
    %2 = tpu.memref_slice %arg2[%c0_i32_0] : memref<1x!tpu.dma_semaphore, #tpu.memory_space<semaphore_mem>> -> memref<1x!tpu.dma_semaphore, #tpu.memory_space<semaphore_mem>>
    %3 = tpu.memref_squeeze %2 : memref<1x!tpu.dma_semaphore, #tpu.memory_space<semaphore_mem>> -> memref<!tpu.dma_semaphore, #tpu.memory_space<semaphore_mem>>
    tpu.wait_dma2 semaphore(%3 : memref<!tpu.dma_semaphore, #tpu.memory_space<semaphore_mem>>) src(%arg0 : memref<64x10xf32, #tpu.memory_space<any>>) dst(%arg1 : memref<64x10xf32, #tpu.memory_space<any>>)
    return
  }
}

</mosaic_0001>

<bundles_post_ra>
// kernel: tpu_custom_call.1
= control target key start
LH: loop header
LB: loop body
LE: loop exit
PB: predicated region body
PF: predicated region fallthrough
CT: control target
= control target key end

     0   :  { %s140_s0 = inlined_call_operand.vmem [shape: f32[64,10], index: 0, kind: input, shape index: {}]   ;;  %s141_s1 = inlined_call_operand.vmem [shape: f32[64,10], index: 1, kind: output, shape index: {}]  }
   0x1   :  { %v38_v0 = vld [vmem:[%s140_s0] sm:$0xff]  ;;  %v40_v1 = vld [vmem:[%s140_s0 + $0x8] sm:$0xff]  ;;  %v42_v2 = vld [vmem:[%s140_s0 + $0x10] sm:$0xff] }
   0x2   :  { %39 = vst [vmem:[%s141_s1] sm:$0xff] %v38_v0  ;;  %41 = vst [vmem:[%s141_s1 + $0x8] sm:$0xff] %v40_v1  ;;  %v44_v3 = vld [vmem:[%s140_s0 + $0x18] sm:$0xff]  ;;  %v46_v4 = vld [vmem:[%s140_s0 + $0x20] sm:$0xff] }
   0x3   :  { %43 = vst [vmem:[%s141_s1 + $0x10] sm:$0xff] %v42_v2  ;;  %v48_v5 = vld [vmem:[%s140_s0 + $0x28] sm:$0xff]  ;;  %45 = vst [vmem:[%s141_s1 + $0x18] sm:$0xff] %v44_v3  ;;  %v50_v6 = vld [vmem:[%s140_s0 + $0x30] sm:$0xff] }
   0x4   :  { %47 = vst [vmem:[%s141_s1 + $0x20] sm:$0xff] %v46_v4  ;;  %49 = vst [vmem:[%s141_s1 + $0x28] sm:$0xff] %v48_v5  ;;  %v52_v7 = vld [vmem:[%s140_s0 + $0x38] sm:$0xff] }
   0x5   :  { %51 = vst [vmem:[%s141_s1 + $0x30] sm:$0xff] %v50_v6  ;;  %53 = vst [vmem:[%s141_s1 + $0x38] sm:$0xff] %v52_v7 }
   0x6   :  { %61 = vsyncadd [#allocation2], 1024 }
   0x7   :  { %80 = dma.done.wait [#allocation2], 1024 }
   0x8   :  { %81 = vsyncadd [#allocation2], 4294966272 }
   0x9   :  { %65 = vsyncmov [#allocation2] }
   0xc   :  { %s66_s9 = vpop.sfrf %65 }
   0xd   :  { %p79_p0 = scmp.ne.s32.totalorder %s66_s9, 0 }
   0xf   :  { %70 = shalt.err (%p79_p0)  }

</bundles_post_ra>
